<compile_context>
chip_gen: v7x
topology: tpu7x:2x2x1
jax: 0.10.0
libtpu: 0.0.40
codegen_flags: <defaults>
</compile_context>

<pallas_src>
import functools
import math

import jax
import jax.numpy as jnp
from jax import lax
from jax.experimental import pallas as pl
from jax.experimental.pallas import tpu as pltpu


def _mha_kernel(x_ref, wqk_ref, w1_ref, b1_ref, w2_ref, b2_ref, out_ref,
                *, n_head, d_model, emb_size, causality, mxu_dtype):
    """One grid step == `block_b` batch elements.

    x_ref  : (Bt, S, Din)     concat([seq, pos_enc, time_enc], -1); seq == x[..., :E]
    wqk_ref: (Din, 2*H*Dm)    fused per-head [Q | K] projections (Q part pre-scaled), bf16
    w1_ref : (H, E, E)        pos_ff first linear, split per head, bf16
    b1_ref : (1, E)           f32
    w2_ref : (E, E)           bf16
    b2_ref : (1, E)           f32
    out_ref: (Bt*S, E)
    """
    Bt, S, Din = x_ref.shape
    H, Dm, E = n_head, d_model, emb_size
    f32 = jnp.float32

    x3 = x_ref[...]                                   # (Bt, S, Din) f32
    v = x3[:, :, :E]                                  # values == raw seq (slab prefix)
    x2 = x3.reshape(Bt * S, Din).astype(mxu_dtype)    # leading-dim merge (minor unchanged)

    # Fused Q & K projection for all heads: one MXU pass (Wq pre-scaled by 1/sqrt(Dm)).
    qk_all = jnp.dot(x2, wqk_ref[...], preferred_element_type=f32)   # (Bt*S, 2*H*Dm)
    qk3 = qk_all.reshape(Bt, S, 2 * H * Dm)

    # Fold (head, batch) into one leading dim G = H*Bt so scores / softmax / p@v are
    # single head-batched ops (equivalent to einsum('bqhd,bkhd->bhqk') etc., but every
    # contraction stays a plain single-batch-dim matmul for robust Mosaic lowering).
    q_g = jnp.concatenate([qk3[:, :, h * Dm:(h + 1) * Dm] for h in range(H)], axis=0)
    k_g = jnp.concatenate([qk3[:, :, (H + h) * Dm:(H + h + 1) * Dm] for h in range(H)],
                          axis=0)
    v_g = jnp.concatenate([v] * H, axis=0).astype(mxu_dtype)         # (H*Bt, S, E)

    att = jnp.einsum('gqd,gkd->gqk', q_g.astype(mxu_dtype), k_g.astype(mxu_dtype),
                     preferred_element_type=f32)                     # (H*Bt, S, S) f32

    # masked_softmax semantics: clamp(max=10) -> masked_fill -> softmax(-1); f32 math.
    att = jnp.minimum(att, 10.0)
    if causality:
        row = lax.broadcasted_iota(jnp.int32, (S, S), 0)
        col = lax.broadcasted_iota(jnp.int32, (S, S), 1)
        keep = (col >= row)[None]        # torch.triu keeps upper triangle incl. diagonal
        att = jnp.where(keep, att, -1e30)   # finite fill: no NaN if a row is fully masked
    m = jnp.max(att, axis=-1, keepdims=True)
    p = jnp.exp(att - m)
    p = p * pl.reciprocal(jnp.sum(p, axis=-1, keepdims=True), approx=True)

    heads = jnp.einsum('gqk,gkd->gqd', p.astype(mxu_dtype), v_g,
                       preferred_element_type=f32)                   # (H*Bt, S, E) f32

    # pos_ff first linear: sum_h (head_h @ W1[h]) == concat(head_0..head_{H-1}) @ W1,
    # with the bias folded into the accumulator init (single broadcast, no extra add).
    acc = jnp.broadcast_to(b1_ref[...], (Bt * S, E))
    for h in range(H):        # H is small; each iteration is one real (Bt*S, E)x(E, E) matmul
        head_h = heads[h * Bt:(h + 1) * Bt].reshape(Bt * S, E)
        acc = acc + jnp.dot(head_h.astype(mxu_dtype), w1_ref[h],
                            preferred_element_type=f32)

    h1 = jnp.tanh(acc)                                                       # f32
    out = jnp.dot(h1.astype(mxu_dtype), w2_ref[...],
                  preferred_element_type=f32) + b2_ref[...]                  # (Bt*S, E)
    out_ref[...] = out.astype(out_ref.dtype)


def prepare_params(params, *, matmul_dtype=jnp.bfloat16):
    """One-time parameter transform, hoisted off the per-call launch path."""
    wq, wk = params["wq"], params["wk"]              # (H, Din, Dm), y = x @ W convention
    w1, b1, w2, b2 = params["w1"], params["b1"], params["w2"], params["b2"]
    H, Din, Dm = wq.shape
    E = w2.shape[0]
    scale = 1.0 / math.sqrt(float(Dm))
    # Fold the 1/sqrt(d_model) score scale into Wq and fuse all per-head [Q | K]
    # projections into a single (Din, 2*H*Dm) matrix (head-major columns).
    wq_all = jnp.transpose(wq * scale, (1, 0, 2)).reshape(Din, H * Dm)
    wk_all = jnp.transpose(wk, (1, 0, 2)).reshape(Din, H * Dm)
    wqk = jnp.concatenate([wq_all, wk_all], axis=-1).astype(matmul_dtype)
    return {
        "wqk": wqk,                                        # (Din, 2*H*Dm)
        "w1": w1.reshape(H, E, E).astype(matmul_dtype),    # per-head slices of pos_ff W1
        "b1": b1.astype(jnp.float32),                      # (1, E)
        "w2": w2.astype(matmul_dtype),                     # (E, E)
        "b2": b2.astype(jnp.float32),                      # (1, E)
        "n_head": H, "d_model": Dm, "emb_size": E, "input_dim": Din,
        "matmul_dtype": matmul_dtype,
    }


def multi_head_attention(seq, pos_enc, time_enc, prepared, *, causality=True,
                         block_b=None, core_parallel=False):
    """seq: [B,S,E]; pos_enc/time_enc: [B,S,enc_dim] or None; prepared = prepare_params()."""
    # TODO(synk): cluster_mask path of SingleAttention is not implemented (assumed None).
    # TODO(synk): non-Identity activation after the q/k projections is not implemented.
    x = seq
    if pos_enc is not None:
        x = jnp.concatenate([x, pos_enc], axis=-1)
    if time_enc is not None:
        x = jnp.concatenate([x, time_enc], axis=-1)

    B, S, E = seq.shape
    Din = x.shape[-1]
    H, Dm = prepared["n_head"], prepared["d_model"]
    assert Din == prepared["input_dim"] and E == prepared["emb_size"]

    if block_b is None:
        # Feed >= ~512 rows per grid step to the MXU when the batch allows it (fills the
        # 256-row v6e/v7x MXU and the 128-row v5e MXU, and leaves >= 2 grid steps for
        # megacore / v7x's 2 TensorCores once B*S >= 1024).  Tiny batches collapse to a
        # single grid step so a 1-TC chip pays the per-step overhead exactly once.
        target_rows = 512
        block_b = B
        for d in range(1, B + 1):
            if B % d == 0 and d * S >= target_rows:
                block_b = d
                break
    assert B % block_b == 0, "block_b must divide the batch size"
    grid_b = B // block_b

    kernel = functools.partial(
        _mha_kernel, n_head=H, d_model=Dm, emb_size=E, causality=causality,
        mxu_dtype=prepared["matmul_dtype"])

    # On v7x, call with core_parallel=True (and >= 2 grid steps) to shard the batch axis
    # across the two TensorCores; plain "parallel" is the safe default elsewhere.
    sem = pltpu.CORE_PARALLEL if core_parallel else "parallel"

    out2d = pl.pallas_call(
        kernel,
        out_shape=jax.ShapeDtypeStruct((B * S, E), seq.dtype),
        grid_spec=pltpu.PrefetchScalarGridSpec(
            num_scalar_prefetch=0,
            grid=(grid_b,),
            in_specs=[
                pl.BlockSpec((block_b, S, Din), lambda b: (b, 0, 0)),
                pl.BlockSpec((Din, 2 * H * Dm), lambda b: (0, 0)),
                pl.BlockSpec((H, E, E), lambda b: (0, 0, 0)),
                pl.BlockSpec((1, E), lambda b: (0, 0)),
                pl.BlockSpec((E, E), lambda b: (0, 0)),
                pl.BlockSpec((1, E), lambda b: (0, 0)),
            ],
            out_specs=pl.BlockSpec((block_b * S, E), lambda b: (b, 0)),
        ),
        compiler_params=pltpu.CompilerParams(dimension_semantics=(sem,)),
    )(x, prepared["wqk"], prepared["w1"], prepared["b1"],
      prepared["w2"], prepared["b2"])
    return out2d.reshape(B, S, E)


def _reference(seq, pos_enc, time_enc, params, *, causality=True):
    """Pure-JAX (f32) replica of the PyTorch forward, for validation."""
    qk = jnp.concatenate([seq, pos_enc, time_enc], axis=-1)
    wq, wk, w1, b1, w2, b2 = (params["wq"], params["wk"], params["w1"],
                              params["b1"], params["w2"], params["b2"])
    H, _, Dm = wq.shape
    S = seq.shape[1]
    heads = []
    for h in range(H):
        q = qk @ wq[h]
        k = qk @ wk[h]
        att = (q @ jnp.swapaxes(k, 1, 2)) / jnp.sqrt(jnp.float32(Dm))
        att = jnp.minimum(att, 10.0)
        if causality:
            mask = jnp.triu(jnp.ones((S, S), bool))   # keeps upper triangle (incl. diag)
            att = jnp.where(mask[None], att, -jnp.inf)
        att = jax.nn.softmax(att, axis=-1)
        heads.append(att @ seq)
    concat = jnp.concatenate(heads, axis=-1)
    h1 = jnp.tanh(concat @ w1 + b1[0])
    return h1 @ w2 + b2[0]


if __name__ == "__main__":
    # Small config consistent with the module:
    #   emb_size = 32, enc_dim = 8 (pos + time), input_dim = 32 + 2*8 = 48,
    #   d_model = 32, n_head = 2, batch = 2, seq_len = 8.
    B, S, E, ENC, DM, H = 2, 8, 32, 8, 32, 2
    DIN = E + 2 * ENC

    key = jax.random.PRNGKey(0)
    ks = jax.random.split(key, 9)
    seq = jax.random.normal(ks[0], (B, S, E), jnp.float32)
    pos_enc = jax.random.normal(ks[1], (B, S, ENC), jnp.float32)
    time_enc = jax.random.normal(ks[2], (B, S, ENC), jnp.float32)

    params = {
        "wq": jax.random.normal(ks[3], (H, DIN, DM), jnp.float32) * 0.05,
        "wk": jax.random.normal(ks[4], (H, DIN, DM), jnp.float32) * 0.05,
        "w1": jax.random.normal(ks[5], (H * E, E), jnp.float32) * 0.05,
        "b1": jax.random.normal(ks[6], (1, E), jnp.float32) * 0.05,
        "w2": jax.random.normal(ks[7], (E, E), jnp.float32) * 0.05,
        "b2": jax.random.normal(ks[8], (1, E), jnp.float32) * 0.05,
    }
    # TODO(synk): nn.Dropout is defined in __init__ but never applied in forward(); omitted.

    ref = _reference(seq, pos_enc, time_enc, params, causality=True)

    # f32-MXU path: the only approximation is the EUP approximate reciprocal (softmax).
    prep_f32 = prepare_params(params, matmul_dtype=jnp.float32)
    out_f32 = jax.block_until_ready(
        multi_head_attention(seq, pos_enc, time_enc, prep_f32, causality=True))
    assert out_f32.shape == (B, S, E)
    assert jnp.allclose(out_f32, ref, atol=2e-3, rtol=2e-3), "f32 kernel mismatch vs reference"

    # bf16-MXU fast path (f32 accumulation, f32 elementwise): tolerance loosened only for
    # bf16 operand rounding; observed error is ~1e-3 at these magnitudes.
    prep_bf16 = prepare_params(params, matmul_dtype=jnp.bfloat16)
    out_bf16 = jax.block_until_ready(
        multi_head_attention(seq, pos_enc, time_enc, prep_bf16, causality=True))
    assert out_bf16.shape == (B, S, E)
    assert jnp.allclose(out_bf16, ref, atol=2e-2, rtol=2e-2), "bf16 kernel mismatch vs reference"

    print("KERNEL_OK")
</pallas_src>

<mosaic_0001>
module attributes {stable_mosaic.version = 11 : i64} {
  func.func @_mha_kernel(%arg0: i32, %arg1: memref<2x8x48xf32, #tpu.memory_space<vmem>>, %arg2: memref<48x128xf32, #tpu.memory_space<vmem>>, %arg3: memref<2x32x32xf32, #tpu.memory_space<vmem>>, %arg4: memref<1x32xf32, #tpu.memory_space<vmem>>, %arg5: memref<32x32xf32, #tpu.memory_space<vmem>>, %arg6: memref<1x32xf32, #tpu.memory_space<vmem>>, %arg7: memref<16x32xf32, #tpu.memory_space<vmem>>) attributes {dimension_semantics = [#tpu.dimension_semantics<parallel>], iteration_bounds = array<i64: 1>, scalar_prefetch = 0 : i64, scratch_operands = 0 : i64, tpu.core_type = #tpu.core_type<tc>, window_params = [{transform_indices = @transform_0, window_bounds = array<i64: 2, 8, 48>}, {pipeline_mode = #tpu.pipeline_mode<synchronous>, transform_indices = @transform_1, window_bounds = array<i64: 48, 128>}, {pipeline_mode = #tpu.pipeline_mode<synchronous>, transform_indices = @transform_2, window_bounds = array<i64: 2, 32, 32>}, {pipeline_mode = #tpu.pipeline_mode<synchronous>, transform_indices = @transform_3, window_bounds = array<i64: 1, 32>}, {pipeline_mode = #tpu.pipeline_mode<synchronous>, transform_indices = @transform_4, window_bounds = array<i64: 32, 32>}, {pipeline_mode = #tpu.pipeline_mode<synchronous>, transform_indices = @transform_5, window_bounds = array<i64: 1, 32>}, {transform_indices = @transform_6, window_bounds = array<i64: 16, 32>}]} {
    %c0 = arith.constant 0 : index
    %c0_0 = arith.constant 0 : index
    %c0_1 = arith.constant 0 : index
    %0 = vector.load %arg1[%c0, %c0_0, %c0_1] : memref<2x8x48xf32, #tpu.memory_space<vmem>>, vector<2x8x48xf32>
    %1 = vector.extract_strided_slice %0 {offsets = [0, 0, 0], sizes = [2, 8, 32], strides = [1, 1, 1]} : vector<2x8x48xf32> to vector<2x8x32xf32>
    %2 = vector.shape_cast %0 : vector<2x8x48xf32> to vector<16x48xf32>
    %c0_2 = arith.constant 0 : index
    %c0_3 = arith.constant 0 : index
    %3 = vector.load %arg2[%c0_2, %c0_3] : memref<48x128xf32, #tpu.memory_space<vmem>>, vector<48x128xf32>
    %cst = arith.constant dense<0.000000e+00> : vector<16x128xf32>
    %4 = tpu.matmul %2, %3, %cst {dimension_numbers = #tpu.dot_dimension_numbers<[1], [0], [0], [1], [0, 0, 1, 1], [], []>} : vector<16x48xf32>, vector<48x128xf32>, vector<16x128xf32> -> vector<16x128xf32>
    %5 = vector.shape_cast %4 : vector<16x128xf32> to vector<2x8x128xf32>
    %6 = vector.extract_strided_slice %5 {offsets = [0, 0, 0], sizes = [2, 8, 32], strides = [1, 1, 1]} : vector<2x8x128xf32> to vector<2x8x32xf32>
    %7 = vector.extract_strided_slice %5 {offsets = [0, 0, 32], sizes = [2, 8, 32], strides = [1, 1, 1]} : vector<2x8x128xf32> to vector<2x8x32xf32>
    %8 = tpu.concatenate %6, %7 in 0 : vector<2x8x32xf32>, vector<2x8x32xf32> -> vector<4x8x32xf32>
    %9 = vector.extract_strided_slice %5 {offsets = [0, 0, 64], sizes = [2, 8, 32], strides = [1, 1, 1]} : vector<2x8x128xf32> to vector<2x8x32xf32>
    %10 = vector.extract_strided_slice %5 {offsets = [0, 0, 96], sizes = [2, 8, 32], strides = [1, 1, 1]} : vector<2x8x128xf32> to vector<2x8x32xf32>
    %11 = tpu.concatenate %9, %10 in 0 : vector<2x8x32xf32>, vector<2x8x32xf32> -> vector<4x8x32xf32>
    %12 = tpu.concatenate %1, %1 in 0 : vector<2x8x32xf32>, vector<2x8x32xf32> -> vector<4x8x32xf32>
    "tpu.trace_start"() <{level = 10 : i32, message = "gqd,gkd->gqk"}> : () -> ()
    %cst_4 = arith.constant dense<0.000000e+00> : vector<4x8x8xf32>
    %13 = tpu.matmul %8, %11, %cst_4 {dimension_numbers = #tpu.dot_dimension_numbers<[2], [2], [1], [1], [0, 0, 0, 1, 1, 1], [0], [0]>} : vector<4x8x32xf32>, vector<4x8x32xf32>, vector<4x8x8xf32> -> vector<4x8x8xf32>
    "tpu.trace_stop"() : () -> ()
    %cst_5 = arith.constant 1.000000e+01 : f32
    %14 = vector.broadcast %cst_5 : f32 to vector<4x8x8xf32>
    %15 = arith.minimumf %13, %14 : vector<4x8x8xf32>
    %16 = tpu.iota {dimensions = array<i32: 0>} : vector<8x8xi32>
    %17 = tpu.iota {dimensions = array<i32: 1>} : vector<8x8xi32>
    %18 = arith.cmpi sge, %17, %16 : vector<8x8xi32>
    %19 = vector.shape_cast %18 : vector<8x8xi1> to vector<1x8x8xi1>
    %cst_6 = arith.constant -1.000000e+30 : f32
    %20 = vector.shape_cast %19 : vector<1x8x8xi1> to vector<1x8x8xi1>
    %21 = vector.broadcast %20 : vector<1x8x8xi1> to vector<4x8x8xi1>
    %22 = vector.broadcast %cst_6 : f32 to vector<4x8x8xf32>
    %23 = arith.select %21, %15, %22 : vector<4x8x8xi1>, vector<4x8x8xf32>
    %cst_7 = arith.constant dense<0xFF800000> : vector<4x8xf32>
    %24 = vector.multi_reduction <maximumf>, %23, %cst_7 [2] : vector<4x8x8xf32> to vector<4x8xf32>
    %25 = vector.shape_cast %24 : vector<4x8xf32> to vector<4x8x1xf32>
    %26 = vector.broadcast %25 : vector<4x8x1xf32> to vector<4x8x8xf32>
    %27 = arith.subf %23, %26 : vector<4x8x8xf32>
    %28 = math.exp %27 : vector<4x8x8xf32>
    %cst_8 = arith.constant dense<0.000000e+00> : vector<4x8xf32>
    %29 = vector.multi_reduction <add>, %28, %cst_8 [2] : vector<4x8x8xf32> to vector<4x8xf32>
    %30 = vector.shape_cast %29 : vector<4x8xf32> to vector<4x8x1xf32>
    %31 = tpu.reciprocal %30 {approx = true} : vector<4x8x1xf32> -> vector<4x8x1xf32>
    %32 = vector.broadcast %31 : vector<4x8x1xf32> to vector<4x8x8xf32>
    %33 = arith.mulf %28, %32 : vector<4x8x8xf32>
    "tpu.trace_start"() <{level = 10 : i32, message = "gqk,gkd->gqd"}> : () -> ()
    %cst_9 = arith.constant dense<0.000000e+00> : vector<4x8x32xf32>
    %34 = tpu.matmul %33, %12, %cst_9 {dimension_numbers = #tpu.dot_dimension_numbers<[2], [1], [1], [2], [0, 0, 0, 1, 1, 2], [0], [0]>} : vector<4x8x8xf32>, vector<4x8x32xf32>, vector<4x8x32xf32> -> vector<4x8x32xf32>
    "tpu.trace_stop"() : () -> ()
    %c0_10 = arith.constant 0 : index
    %c0_11 = arith.constant 0 : index
    %35 = vector.load %arg4[%c0_10, %c0_11] : memref<1x32xf32, #tpu.memory_space<vmem>>, vector<1x32xf32>
    %36 = vector.shape_cast %35 : vector<1x32xf32> to vector<1x32xf32>
    %37 = vector.broadcast %36 : vector<1x32xf32> to vector<16x32xf32>
    %38 = vector.extract_strided_slice %34 {offsets = [0, 0, 0], sizes = [2, 8, 32], strides = [1, 1, 1]} : vector<4x8x32xf32> to vector<2x8x32xf32>
    %39 = vector.shape_cast %38 : vector<2x8x32xf32> to vector<16x32xf32>
    %c0_12 = arith.constant 0 : index
    %c0_13 = arith.constant 0 : index
    %c0_14 = arith.constant 0 : index
    %40 = vector.load %arg3[%c0_12, %c0_13, %c0_14] : memref<2x32x32xf32, #tpu.memory_space<vmem>>, vector<1x32x32xf32>
    %41 = vector.shape_cast %40 : vector<1x32x32xf32> to vector<32x32xf32>
    %cst_15 = arith.constant dense<0.000000e+00> : vector<16x32xf32>
    %42 = tpu.matmul %39, %41, %cst_15 {dimension_numbers = #tpu.dot_dimension_numbers<[1], [0], [0], [1], [0, 0, 1, 1], [], []>} : vector<16x32xf32>, vector<32x32xf32>, vector<16x32xf32> -> vector<16x32xf32>
    %43 = arith.addf %37, %42 : vector<16x32xf32>
    %44 = vector.extract_strided_slice %34 {offsets = [2, 0, 0], sizes = [2, 8, 32], strides = [1, 1, 1]} : vector<4x8x32xf32> to vector<2x8x32xf32>
    %45 = vector.shape_cast %44 : vector<2x8x32xf32> to vector<16x32xf32>
    %c1 = arith.constant 1 : index
    %c0_16 = arith.constant 0 : index
    %c0_17 = arith.constant 0 : index
    %46 = vector.load %arg3[%c1, %c0_16, %c0_17] : memref<2x32x32xf32, #tpu.memory_space<vmem>>, vector<1x32x32xf32>
    %47 = vector.shape_cast %46 : vector<1x32x32xf32> to vector<32x32xf32>
    %cst_18 = arith.constant dense<0.000000e+00> : vector<16x32xf32>
    %48 = tpu.matmul %45, %47, %cst_18 {dimension_numbers = #tpu.dot_dimension_numbers<[1], [0], [0], [1], [0, 0, 1, 1], [], []>} : vector<16x32xf32>, vector<32x32xf32>, vector<16x32xf32> -> vector<16x32xf32>
    %49 = arith.addf %43, %48 : vector<16x32xf32>
    %50 = math.tanh %49 : vector<16x32xf32>
    %c0_19 = arith.constant 0 : index
    %c0_20 = arith.constant 0 : index
    %51 = vector.load %arg5[%c0_19, %c0_20] : memref<32x32xf32, #tpu.memory_space<vmem>>, vector<32x32xf32>
    %cst_21 = arith.constant dense<0.000000e+00> : vector<16x32xf32>
    %52 = tpu.matmul %50, %51, %cst_21 {dimension_numbers = #tpu.dot_dimension_numbers<[1], [0], [0], [1], [0, 0, 1, 1], [], []>} : vector<16x32xf32>, vector<32x32xf32>, vector<16x32xf32> -> vector<16x32xf32>
    %c0_22 = arith.constant 0 : index
    %c0_23 = arith.constant 0 : index
    %53 = vector.load %arg6[%c0_22, %c0_23] : memref<1x32xf32, #tpu.memory_space<vmem>>, vector<1x32xf32>
    %54 = vector.broadcast %53 : vector<1x32xf32> to vector<16x32xf32>
    %55 = arith.addf %52, %54 : vector<16x32xf32>
    %c0_24 = arith.constant 0 : index
    %c0_25 = arith.constant 0 : index
    %56 = vector.load %arg7[%c0_24, %c0_25] : memref<16x32xf32, #tpu.memory_space<vmem>>, vector<16x32xf32>
    tpu.vector_store %arg7[%c0_24, %c0_25], %55 {strides = array<i32>} : memref<16x32xf32, #tpu.memory_space<vmem>>, vector<16x32xf32>,
    return
  }
  func.func @transform_0(%arg0: i32) -> (i32, i32, i32) {
    %c0_i32 = arith.constant 0 : i32
    %c0_i32_0 = arith.constant 0 : i32
    %c0_i32_1 = arith.constant 0 : i32
    return %arg0, %c0_i32, %c0_i32_0 : i32, i32, i32
  }
  func.func @transform_1(%arg0: i32) -> (i32, i32) {
    %c0_i32 = arith.constant 0 : i32
    %c0_i32_0 = arith.constant 0 : i32
    %c0_i32_1 = arith.constant 0 : i32
    return %c0_i32, %c0_i32_0 : i32, i32
  }
  func.func @transform_2(%arg0: i32) -> (i32, i32, i32) {
    %c0_i32 = arith.constant 0 : i32
    %c0_i32_0 = arith.constant 0 : i32
    %c0_i32_1 = arith.constant 0 : i32
    %c0_i32_2 = arith.constant 0 : i32
    return %c0_i32, %c0_i32_0, %c0_i32_1 : i32, i32, i32
  }
  func.func @transform_3(%arg0: i32) -> (i32, i32) {
    %c0_i32 = arith.constant 0 : i32
    %c0_i32_0 = arith.constant 0 : i32
    %c0_i32_1 = arith.constant 0 : i32
    return %c0_i32, %c0_i32_0 : i32, i32
  }
  func.func @transform_4(%arg0: i32) -> (i32, i32) {
    %c0_i32 = arith.constant 0 : i32
    %c0_i32_0 = arith.constant 0 : i32
    %c0_i32_1 = arith.constant 0 : i32
    return %c0_i32, %c0_i32_0 : i32, i32
  }
  func.func @transform_5(%arg0: i32) -> (i32, i32) {
    %c0_i32 = arith.constant 0 : i32
    %c0_i32_0 = arith.constant 0 : i32
    %c0_i32_1 = arith.constant 0 : i32
    return %c0_i32, %c0_i32_0 : i32, i32
  }
  func.func @transform_6(%arg0: i32) -> (i32, i32) {
    %c0_i32 = arith.constant 0 : i32
    %c0_i32_0 = arith.constant 0 : i32
    return %arg0, %c0_i32 : i32, i32
  }
}

</mosaic_0001>

<bundles_post_ra>
// kernel: tpu_custom_call.1
= control target key start
LH: loop header
LB: loop body
LE: loop exit
PB: predicated region body
PF: predicated region fallthrough
CT: control target
= control target key end

     0   :  { %11 = vsyncpa [#allocation3], 0  ;;  %s1679_s0 = inlined_call_operand.hbm [shape: f32[2,8,48], index: 0, kind: input, shape index: {}]   ;;  %s1680_s1 = inlined_call_operand.hbm [shape: f32[48,128], index: 1, kind: input, shape index: {}]   ;;  %s1681_s2 = inlined_call_operand.hbm [shape: f32[2,32,32], index: 2, kind: input, shape index: {}]   ;;  %s1682_s3 = inlined_call_operand.vmem [shape: f32[1,32], index: 3, kind: input, shape index: {}]   ;;  %s1683_s4 = inlined_call_operand.hbm [shape: f32[32,32], index: 4, kind: input, shape index: {}]   ;;  %s1684_s5 = inlined_call_operand.vmem [shape: f32[1,32], index: 5, kind: input, shape index: {}]   ;;  %s1685_s6 = inlined_call_operand.hbm [shape: f32[16,32], index: 6, kind: output, shape index: {}]  }
   0x1   :  { %12 = vsyncpa [#allocation6], 0 }
   0x2   :  { %13 = vsyncpa [#allocation9], 0 }
   0x3   :  { %14 = vsyncpa [#allocation4], 0  ;;  %s1470_s21 = smov [#allocation5]   ;;  %s1471_s23 = smov [#allocation2]  }
   0x4   :  { %s32_s22 = sshll.u32 %s1470_s21, 4  ;;  %s20_s24 = sshll.u32 %s1471_s23, 4  ;;  %s33_s22 = int_to_ptr.vmem [resolvable:$true] %s32_s22  ;;  %s1516_s24 = int_to_ptr.vmem [resolvable:$true] %s20_s24 }
   0x5   :  { %s1352_s27 = scalar_lea.hbm %s1680_s1, 768 }
   0x6   :  { %p1353_p0 = scmp.ne.s32.totalorder %s1680_s1, %s1352_s27  ;;  %p1356_p1 = scmp.lt.u32.totalorder %s1352_s27, %s1680_s1 }
   0x8   :  { %p1358_p2 = pnand %p1356_p1, %p1353_p0 }
   0xa   :  { %1361 = shalt.err (!%p1358_p2)
}
   0xb   :  { %s1362_s8 = scalar_lea.vmem %s33_s22, 768  ;;  %p1367_p4 = scmp.lt.s32.totalorder %s33_s22, %s33_s22 }
   0xc   :  { %p1363_p3 = scmp.ne.s32.totalorder %s33_s22, %s1362_s8  ;;  %p1368_p5 = scmp.lt.s32.totalorder %s1362_s8, %s1362_s8 }
   0xe   :  { %p1369_p6 = por %p1368_p5, %p1367_p4 }
  0x10   :  { %p1370_p7 = pnand %p1369_p6, %p1363_p3 }
  0x12   :  { %1373 = shalt.err (!%p1370_p7)
}
  0x13   :  { %s1472_s9 = smov 128   ;;  %s1473_s10 = smov 8  }
  0x14   :  { %38 = dma.hbm_to_vmem [thread:$0]  %s1680_s1, 768, %s33_s22, [#allocation6], %s1472_s9, %s1472_s9, %s1473_s10  }
  0x15   :  { %s1374_s15 = scalar_lea.hbm %s1679_s0, 256 }
  0x16   :  { %p1375_p8 = scmp.ne.s32.totalorder %s1679_s0, %s1374_s15  ;;  %p1378_p9 = scmp.lt.u32.totalorder %s1374_s15, %s1679_s0 }
  0x18   :  { %p1380_p10 = pnand %p1378_p9, %p1375_p8 }
  0x1a   :  { %1383 = shalt.err (!%p1380_p10)
}
  0x1b   :  { %s1384_s20 = scalar_lea.vmem %s1516_s24, 256  ;;  %p1389_p12 = scmp.lt.s32.totalorder %s1516_s24, %s1516_s24 }
  0x1c   :  { %p1385_p11 = scmp.ne.s32.totalorder %s1516_s24, %s1384_s20  ;;  %p1390_p13 = scmp.lt.s32.totalorder %s1384_s20, %s1384_s20 }
  0x1e   :  { %p1391_p0 = por %p1390_p13, %p1389_p12 }
  0x20   :  { %p1392_p1 = pnand %p1391_p0, %p1385_p11 }
  0x22   :  { %1395 = shalt.err (!%p1392_p1)
}
  0x23   :  { %26 = dma.hbm_to_vmem [thread:$0]  %s1679_s0, 256, %s1516_s24, [#allocation3], %s1472_s9, %s1472_s9, %s1473_s10  }
  0x24   :  { %s1474_s22 = smov [#allocation7]   ;;  %s1475_s25 = smov [#allocation8]  }
  0x25   :  { %s44_s23 = sshll.u32 %s1474_s22, 4  ;;  %s58_s26 = sshll.u32 %s1475_s25, 4  ;;  %s45_s23 = int_to_ptr.vmem [resolvable:$true] %s44_s23  ;;  %s1553_s26 = int_to_ptr.vmem [resolvable:$true] %s58_s26 }
  0x26   :  { %s1396_s29 = scalar_lea.hbm %s1681_s2, 1024 }
  0x27   :  { %p1397_p2 = scmp.ne.s32.totalorder %s1681_s2, %s1396_s29  ;;  %p1400_p3 = scmp.lt.u32.totalorder %s1396_s29, %s1681_s2 }
  0x29   :  { %p1402_p4 = pnand %p1400_p3, %p1397_p2 }
  0x2b   :  { %1405 = shalt.err (!%p1402_p4)
}
  0x2c   :  { %s1406_s0 = scalar_lea.vmem %s45_s23, 1024  ;;  %p1411_p6 = scmp.lt.s32.totalorder %s45_s23, %s45_s23 }
  0x2d   :  { %p1407_p5 = scmp.ne.s32.totalorder %s45_s23, %s1406_s0  ;;  %p1412_p7 = scmp.lt.s32.totalorder %s1406_s0, %s1406_s0 }
  0x2f   :  { %p1413_p8 = por %p1412_p7, %p1411_p6 }
  0x31   :  { %p1414_p9 = pnand %p1413_p8, %p1407_p5 }
  0x33   :  { %1417 = shalt.err (!%p1414_p9)
}
  0x34   :  { %50 = dma.hbm_to_vmem [thread:$0]  %s1681_s2, 1024, %s45_s23, [#allocation6], %s1472_s9, %s1472_s9, %s1473_s10  }
  0x35   :  { %s1418_s15 = scalar_lea.hbm %s1683_s4, 512 }
  0x36   :  { %p1419_p10 = scmp.ne.s32.totalorder %s1683_s4, %s1418_s15  ;;  %p1422_p11 = scmp.lt.u32.totalorder %s1418_s15, %s1683_s4 }
  0x38   :  { %p1424_p12 = pnand %p1422_p11, %p1419_p10 }
  0x3a   :  { %1427 = shalt.err (!%p1424_p12)
}
  0x3b   :  { %s1428_s20 = scalar_lea.vmem %s1553_s26, 512  ;;  %p1433_p0 = scmp.lt.s32.totalorder %s1553_s26, %s1553_s26 }
  0x3c   :  { %p1429_p13 = scmp.ne.s32.totalorder %s1553_s26, %s1428_s20  ;;  %p1434_p1 = scmp.lt.s32.totalorder %s1428_s20, %s1428_s20 }
  0x3e   :  { %p1435_p2 = por %p1434_p1, %p1433_p0 }
  0x40   :  { %p1436_p3 = pnand %p1435_p2, %p1429_p13 }
  0x42   :  { %1439 = shalt.err (!%p1436_p3)
}
  0x43   :  { %64 = dma.hbm_to_vmem [thread:$0]  %s1683_s4, 512, %s1553_s26, [#allocation9], %s1472_s9, %s1472_s9, %s1473_s10  }
  0x44   :  { %1462 = dma.done.wait [#allocation3], 256  }
  0x45   :  { %1463 = vsyncadd [#allocation3], 4294967040 }
  0x46   :  { %1464 = dma.done.wait [#allocation6], 1792  }
  0x47   :  { %1465 = vsyncadd [#allocation6], 4294965504 }
  0x48   :  { %1466 = dma.done.wait [#allocation9], 512  }
  0x49   :  { %1467 = vsyncadd [#allocation9], 4294966784  ;;  %v81_v0 = vld [vmem:[#allocation5] sm:$0xff]  ;;  %v82_v1 = vld [vmem:[#allocation5 + $0x8] sm:$0xff]  ;;  %vm87_vm0 = vcmask 392192   ;;  %v1476_v11 = vmov 0.0   ;;  %v484_v20 = vlaneseq }
  0x4a   :  { %v83_v2 = vld [vmem:[#allocation5 + $0x10] sm:$0xff]  ;;  %v1281_v3 = vpack.c.bf16 %v82_v1, %v81_v0  ;;  %v84_v4 = vld [vmem:[#allocation5 + $0x18] sm:$0xff]  ;;  %v85_v6 = vld [vmem:[#allocation5 + $0x20] sm:$0xff]  ;;  %1208 = vmatprep.subr.mxu1 %v1476_v11  ;;  %vm1477_vm1 = vmmov 0   ;;  %s1478_s4 = smov 64   ;;  %s1479_s21 = smov 96  }
  0x4b   :  { %v1285_v5 = vpack.c.bf16 %v84_v4, %v83_v2  ;;  %v86_v7 = vld [vmem:[#allocation5 + $0x28] sm:$0xff]  ;;  %v1590_v8 = vld [vmem:[#allocation2] sm:$0xff]  ;;  %v1594_v10 = vld [vmem:[#allocation2 + $0x8] sm:$0xff]  ;;  %1210 = vmatprep.mubr.msk.f32.mxu1 %vm1477_vm1, %v1476_v11  ;;  %vm177_vm2 = vcmask 261120   ;;  %v485_v21 = vshrl.u32 %v484_v20, 7  ;;  %v487_v22 = vand.u32 127, %v484_v20 }
  0x4c   :  { %1282 = vmatprep.subr.bf16.mxu0 %v1281_v3  ;;  %1205 = vmatprep.mubr.msk.f32.mxu0 %vm87_vm0, %v1590_v8  ;;  %v1289_v9 = vpack.c.bf16 %v86_v7, %v85_v6  ;;  %vm495_vm4 = vcmask 64512   ;;  %v839_v1 = vld [vmem:[#allocation7] sm:$0xff]  ;;  %v840_v2 = vld [vmem:[#allocation7 + $0x8] sm:$0xff]  ;;  %s1480_s27 = smov [#allocation10]  }
  0x4d   :  { %1284 = vmatpush3.bf16.msra.mxu0 %v1281_v3  ;;  %vm488_vm3 = vcmp.ge.s32.totalorder %v487_v22, %v485_v21  ;;  %v929_v21 = vld [vmem:[#allocation7 + $0x30] sm:$0xff]  ;;  %v930_v22 = vld [vmem:[#allocation7 + $0x38] sm:$0xff]  ;;  %s1115_s28 = sshll.u32 %s1480_s27, 4  ;;  %s1116_s28 = int_to_ptr.vmem [resolvable:$true] %s1115_s28 }
  0x4e   :  { %1286 = vmatprep.subr.bf16.mxu0 %v1285_v5  ;;  %p1445_p5 = scmp.lt.s32.totalorder %s1116_s28, %s1116_s28 }
  0x51   :  { %1288 = vmatpush3.bf16.msra.mxu0 %v1285_v5  ;;  %v1293_v5 = vpack.c.bf16 %v840_v2, %v839_v1 }
  0x52   :  { %1290 = vmatprep.subr.bf16.mxu0 %v1289_v9 }
  0x55   :  { %1292 = vmatpush3.bf16.msra.mxu0 %v1289_v9 }
  0x56   :  { %1223 = vmatprep.subr.mxu0 %v1476_v11 }
  0x58   :  { %1206 = vmatmul.mubr.msk.f32.vlgmr.msra.gmra.mrb[0].mxu0 %vm87_vm0, %v1594_v10 }
  0x59   :  { %1225 = vmatprep.mubr.msk.f32.mxu0 %vm1477_vm1, %v1476_v11 }
 0x12b   :  { %v1207_v12 = vpop.f32.mrb[0].mxu0 }
 0x12c   :  { %v160_v13 = vpop.f32.mrb[1].mxu0 }
 0x12d   :  { %175 = vrot.lane.b32.xlu1 %v160_v13, %s1478_s4  ;;  %171 = vrot.lane.b32.xlu0 %v160_v13, %s1479_s21 }
 0x131   :  { %252 = vrot.lane.b32.xlu1 %v1207_v12, %s1478_s4  ;;  %173 = vrot.lane.b32.xlu0 %v1207_v12, %s1479_s21 }
 0x19f   :  { %v176_v14 = vpop.permute.xlu1 %175  ;;  %v172_v15 = vpop.permute.xlu0 %171 }
 0x1a0   :  { %1209 = vmatpush3.xpose.msk.msra.mxu1 %vm177_vm2, %v176_v14  ;;  %328 = vrot.lane.b32.xlu0 %v172_v15, %s1478_s4  ;;  %v842_v14 = vld [vmem:[#allocation7 + $0x18] sm:$0xff] }
 0x1a1   :  { %1213 = vmatprep.subr.mxu1 %v1476_v11 }
 0x1a3   :  { %1211 = vmatmul.mubr.msk.f32.vlgmr.msra.gmra.mrb[0].mxu1 %vm177_vm2, %v160_v13  ;;  %v253_v16 = vpop.permute.xlu1 %252  ;;  %v174_v17 = vpop.permute.xlu0 %173  ;;  %v841_v13 = vld [vmem:[#allocation7 + $0x10] sm:$0xff] }
 0x1a4   :  { %1214 = vmatpush3.xpose.msk.msra.mxu1 %vm177_vm2, %v253_v16  ;;  %404 = vrot.lane.b32.xlu1 %v174_v17, %s1478_s4  ;;  %v1297_v16 = vpack.c.bf16 %v842_v14, %v841_v13 }
 0x1a5   :  { %1215 = vmatprep.mubr.msk.f32.mxu1 %vm1477_vm1, %v1476_v11  ;;  %1218 = vmatprep.subr.mxu1 %v1476_v11 }
 0x1a7   :  { %1216 = vmatmul.mubr.msk.f32.vlgmr.msra.gmra.mrb[2].mxu1 %vm177_vm2, %v1207_v12 }
 0x1a8   :  { %1220 = vmatprep.mubr.msk.f32.mxu1 %vm1477_vm1, %v1476_v11 }
 0x212   :  { %v329_v18 = vpop.permute.xlu0 %328 }
 0x213   :  { %1219 = vmatpush3.xpose.msk.msra.mxu1 %vm177_vm2, %v329_v18  ;;  %v928_v18 = vld [vmem:[#allocation7 + $0x28] sm:$0xff] }
 0x214   :  { %1228 = vmatprep.subr.mxu1 %v1476_v11 }
 0x216   :  { %v405_v19 = vpop.permute.xlu1 %404  ;;  %1221 = vmatmul.mubr.msk.f32.vlgmr.msra.gmra.mrb[4].mxu1 %vm177_vm2, %v172_v15 }
 0x217   :  { %1224 = vmatpush3.xpose.msk.msra.mxu0 %vm177_vm2, %v405_v19  ;;  %1229 = vmatpush3.msra.mxu1 %v1590_v8 }
 0x218   :  { %1230 = vmatprep.mubr.msk.f32.mxu1 %vm1477_vm1, %v1476_v11  ;;  %1233 = vmatprep.subr.mxu0 %v1476_v11 }
 0x219   :  { %1238 = vmatprep.subr.mxu1 %v1476_v11 }
 0x21a   :  { %1226 = vmatmul.mubr.msk.f32.vlgmr.msra.gmra.mrb[2].mxu0 %vm177_vm2, %v174_v17  ;;  %v927_v17 = vld [vmem:[#allocation7 + $0x20] sm:$0xff] }
 0x21b   :  { %1234 = vmatpush3.msra.mxu0 %v1594_v10  ;;  %1235 = vmatprep.mubr.msk.f32.mxu0 %vm1477_vm1, %v1476_v11 }
 0x21c   :  { %1243 = vmatprep.subr.mxu0 %v1476_v11 }
 0x276   :  { %v248_v23 = vpop.f32.mrb[0].mxu1 }
 0x277   :  { %v480_v24 = vmin.f32 %v248_v23, 10.0  ;;  %v1212_v25 = vpop.f32.mrb[1].mxu1 }
 0x279   :  { %v491_v26 = vsel %vm488_vm3, %v480_v24, -1e+30  ;;  %v1305_v24 = vpack.c.bf16 %v930_v22, %v929_v21 }
 0x27a   :  { %v324_v27 = vpop.f32.mrb[2].mxu1  ;;  %v496_v28 = vsel %vm495_vm4, %v491_v26, -inf }
 0x27b   :  { %v481_v29 = vmin.f32 %v324_v27, 10.0  ;;  %v1217_v30 = vpop.f32.mrb[3].mxu1  ;;  %497 = vmax.xlane.f32.xlu0 %v496_v28 }
 0x27d   :  { %v492_v31 = vsel %vm488_vm3, %v481_v29, -1e+30 }
 0x27e   :  { %v499_v32 = vsel %vm495_vm4, %v492_v31, -inf }
 0x27f   :  { %500 = vmax.xlane.f32.xlu1 %v499_v32  ;;  %v1017_v32 = vld [vmem:[#allocation8 + $0x8] sm:$0xff] }
 0x2e9   :  { %v400_v33 = vpop.f32.mrb[4].mxu1 }
 0x2ea   :  { %v482_v34 = vmin.f32 %v400_v33, 10.0  ;;  %v1222_v35 = vpop.f32.mrb[5].mxu1  ;;  %v1018_v33 = vld [vmem:[#allocation8 + $0x10] sm:$0xff] }
 0x2eb   :  { %v1019_v35 = vld [vmem:[#allocation8 + $0x18] sm:$0xff] }
 0x2ec   :  { %v493_v36 = vsel %vm488_vm3, %v482_v34, -1e+30 }
 0x2ed   :  { %v476_v37 = vpop.f32.mrb[2].mxu0  ;;  %v502_v38 = vsel %vm495_vm4, %v493_v36, -inf }
 0x2ee   :  { %v483_v39 = vmin.f32 %v476_v37, 10.0  ;;  %v1227_v40 = vpop.f32.mrb[3].mxu0  ;;  %503 = vmax.xlane.f32.xlu0 %v502_v38  ;;  %v1143_v37 = vld [vmem:[%s1682_s3] ss:$0 sm:$0xff]  ;;  %s1440_s3 = scalar_lea.vmem %s1116_s28, 256 }
 0x2ef   :  { %p1441_p4 = scmp.ne.s32.totalorder %s1116_s28, %s1440_s3  ;;  %p1446_p6 = scmp.lt.s32.totalorder %s1440_s3, %s1440_s3 }
 0x2f0   :  { %v494_v41 = vsel %vm488_vm3, %v483_v39, -1e+30 }
 0x2f1   :  { %v505_v42 = vsel %vm495_vm4, %v494_v41, -inf  ;;  %p1447_p7 = por %p1446_p6, %p1445_p5 }
 0x2f2   :  { %506 = vmax.xlane.f32.xlu0 %v505_v42 }
 0x2f3   :  { %p1448_p8 = pnand %p1447_p7, %p1441_p4 }
 0x308   :  { %v498_v43 = vpop.xlane.xlu0 %497 }
 0x309   :  { %v508_v44 = vsub.f32 %v491_v26, %v498_v43 }
 0x30b   :  { %v512_v45 = vmul.f32 1.442695, %v508_v44  ;;  %v1148_v44 = vld [vmem:[%s1684_s5] ss:$0 sm:$0xff] }
 0x30c   :  { %v501_v46 = vpop.xlane.xlu1 %500 }
 0x30d   :  { %1332 = vpow2.f32 %v512_v45  ;;  %v509_v47 = vsub.f32 %v492_v31, %v501_v46  ;;  %v1016_v31 = vld [vmem:[#allocation8] sm:$0xff] }
 0x30e   :  { %v1309_v34 = vpack.c.bf16 %v1017_v32, %v1016_v31 }
 0x30f   :  { %v514_v48 = vmul.f32 1.442695, %v509_v47 }
 0x311   :  { %1334 = vpow2.f32 %v514_v48 }
 0x317   :  { %v1333_v49 = vpop.eup %1332 }
 0x318   :  { %v520_v50 = vsel %vm495_vm4, %v1333_v49, 0.0 }
 0x319   :  { %521 = vadd.xlane.f32.xlu1 %v520_v50 }
 0x31b   :  { %v1335_v51 = vpop.eup %1334 }
 0x31c   :  { %v523_v52 = vsel %vm495_vm4, %v1335_v51, 0.0 }
 0x31d   :  { %524 = vadd.xlane.f32.xlu0 %v523_v52 }
 0x37b   :  { %v504_v53 = vpop.xlane.xlu0 %503 }
 0x37c   :  { %v510_v54 = vsub.f32 %v493_v36, %v504_v53  ;;  %v1313_v36 = vpack.c.bf16 %v1019_v35, %v1018_v33 }
 0x37e   :  { %v516_v55 = vmul.f32 1.442695, %v510_v54 }
 0x37f   :  { %v507_v56 = vpop.xlane.xlu0 %506 }
 0x380   :  { %1336 = vpow2.f32 %v516_v55  ;;  %v511_v57 = vsub.f32 %v494_v41, %v507_v56 }
 0x382   :  { %v518_v58 = vmul.f32 1.442695, %v511_v57 }
 0x384   :  { %1338 = vpow2.f32 %v518_v58 }
 0x38a   :  { %v1337_v59 = vpop.eup %1336 }
 0x38b   :  { %v526_v60 = vsel %vm495_vm4, %v1337_v59, 0.0 }
 0x38c   :  { %527 = vadd.xlane.f32.xlu1 %v526_v60 }
 0x38e   :  { %v1339_v61 = vpop.eup %1338 }
 0x38f   :  { %v529_v62 = vsel %vm495_vm4, %v1339_v61, 0.0 }
 0x390   :  { %530 = vadd.xlane.f32.xlu0 %v529_v62 }
 0x3a6   :  { %v522_v63 = vpop.xlane.xlu1 %521 }
 0x3a7   :  { %1340 = vrcp.f32 %v522_v63 }
 0x3aa   :  { %v525_v0 = vpop.xlane.xlu0 %524 }
 0x3ab   :  { %1342 = vrcp.f32 %v525_v0 }
 0x3b1   :  { %v1341_v3 = vpop.eup %1340 }
 0x3b2   :  { %v536_v4 = vmul.f32 %v1341_v3, %v1333_v49 }
 0x3b4   :  { %1231 = vmatmul.mubr.msk.f32.vlgmr.msra.gmra.mrb[6].mxu1 %vm495_vm4, %v536_v4 }
 0x3b5   :  { %v1343_v6 = vpop.eup %1342  ;;  %1239 = vmatpush3.msra.mxu1 %v1590_v8  ;;  %1240 = vmatprep.mubr.msk.f32.mxu1 %vm1477_vm1, %v1476_v11 }
 0x3b6   :  { %v537_v7 = vmul.f32 %v1343_v6, %v1335_v51  ;;  %1294 = vmatprep.subr.bf16.mxu1 %v1293_v5 }
 0x3b8   :  { %1236 = vmatmul.mubr.msk.f32.vlgmr.msra.gmra.mrb[4].mxu0 %vm495_vm4, %v537_v7 }
 0x3b9   :  { %1244 = vmatpush3.msra.mxu0 %v1594_v10  ;;  %1245 = vmatprep.mubr.msk.f32.mxu0 %vm1477_vm1, %v1476_v11  ;;  %v1301_v10 = vpack.c.bf16 %v928_v18, %v927_v17 }
 0x3ba   :  { %1310 = vmatprep.subr.bf16.mxu0 %v1309_v34 }
 0x419   :  { %v528_v9 = vpop.xlane.xlu1 %527 }
 0x41a   :  { %1344 = vrcp.f32 %v528_v9 }
 0x41d   :  { %v531_v12 = vpop.xlane.xlu0 %530 }
 0x41e   :  { %1346 = vrcp.f32 %v531_v12 }
 0x424   :  { %v1345_v15 = vpop.eup %1344 }
 0x425   :  { %v538_v8 = vmul.f32 %v1345_v15, %v1337_v59 }
 0x427   :  { %1241 = vmatmul.mubr.msk.f32.vlgmr.msra.gmra.mrb[8].mxu1 %vm495_vm4, %v538_v8 }
 0x428   :  { %v1347_v19 = vpop.eup %1346  ;;  %1296 = vmatpush3.bf16.msra.mxu1 %v1293_v5 }
 0x429   :  { %v539_v20 = vmul.f32 %v1347_v19, %v1339_v61  ;;  %1298 = vmatprep.subr.bf16.mxu1 %v1297_v16 }
 0x42b   :  { %1246 = vmatmul.mubr.msk.f32.vlgmr.msra.gmra.mrb[6].mxu0 %vm495_vm4, %v539_v20 }
 0x42c   :  { %1300 = vmatpush3.bf16.msra.mxu1 %v1297_v16  ;;  %1312 = vmatpush3.bf16.msra.mxu0 %v1309_v34 }
 0x42d   :  { %1302 = vmatprep.subr.bf16.mxu1 %v1301_v10  ;;  %1314 = vmatprep.subr.bf16.mxu0 %v1313_v36 }
 0x430   :  { %1316 = vmatpush3.bf16.msra.mxu0 %v1313_v36 }
 0x487   :  { %v609_v11 = vpop.f32.mrb[6].mxu1 }
 0x488   :  { %v1232_v23 = vpop.f32.mrb[7].mxu1  ;;  %1256 = vmatprep.mubr.msk.f32.mxu1 %vm177_vm2, %v609_v11 }
 0x48b   :  { %v682_v25 = vpop.f32.mrb[4].mxu0 }
 0x48c   :  { %v1237_v26 = vpop.f32.mrb[5].mxu0  ;;  %1257 = vmatmul.mubr.msk.f32.vlgmr.msra.gmra.mrb[10].mxu1 %vm177_vm2, %v682_v25 }
 0x48d   :  { %1304 = vmatpush3.bf16.msra.mxu1 %v1301_v10 }
 0x48e   :  { %1306 = vmatprep.subr.bf16.mxu1 %v1305_v24 }
 0x491   :  { %1308 = vmatpush3.bf16.msra.mxu1 %v1305_v24 }
 0x4fa   :  { %v755_v27 = vpop.f32.mrb[8].mxu1 }
 0x4fb   :  { %v1242_v28 = vpop.f32.mrb[9].mxu1  ;;  %1267 = vmatprep.mubr.msk.f32.mxu1 %vm177_vm2, %v755_v27 }
 0x4fe   :  { %v828_v29 = vpop.f32.mrb[6].mxu0 }
 0x4ff   :  { %v1247_v30 = vpop.f32.mrb[7].mxu0  ;;  %1268 = vmatmul.mubr.msk.f32.vlgmr.msra.gmra.mrb[10].mxu1 %vm177_vm2, %v828_v29 }
 0x5d2   :  { %v1269_v38 = vpop.f32.mrb[10].mxu1 }
 0x5d3   :  { %v1317_v39 = vadd.f32 %v1269_v38, %v1143_v37  ;;  %v1003_v40 = vpop.f32.mrb[11].mxu1 }
 0x5d4   :  { %v1318_v41 = vadd.f32 %v1143_v37, %v1003_v40 }
 0x5d6   :  { %1348 = vtanh.f32 %v1318_v41 }
 0x5d7   :  { %1350 = vtanh.f32 %v1317_v39 }
 0x5e0   :  { %v1349_v42 = vpop.eup %1348 }
 0x5e1   :  { %v1351_v43 = vpop.eup %1350  ;;  %1278 = vmatprep.mubr.msk.f32.mxu0 %vm177_vm2, %v1349_v42 }
 0x5e2   :  { %1279 = vmatmul.mubr.msk.f32.vlgmr.msra.gmra.mrb[8].mxu0 %vm177_vm2, %v1351_v43 }
 0x6b5   :  { %v1280_v45 = vpop.f32.mrb[8].mxu0 }
 0x6b6   :  { %v1105_v46 = vadd.f32 %v1280_v45, %v1148_v44  ;;  %v1099_v47 = vpop.f32.mrb[9].mxu0 }
 0x6b7   :  { %v1100_v48 = vadd.f32 %v1148_v44, %v1099_v47 }
 0x6b8   :  { %1109 = vst.msk [vmem:[#allocation10 + $0x8] sm:$0xff] %vm177_vm2, %v1105_v46 }
 0x6b9   :  { %1108 = vst.msk [vmem:[#allocation10] sm:$0xff] %vm177_vm2, %v1100_v48 }
 0x6ba   :  { %1451 = shalt.err (!%p1448_p8)
}
 0x6bb   :  { %s1452_s30 = scalar_lea.hbm %s1685_s6, 256 }
 0x6bc   :  { %p1453_p9 = scmp.ne.s32.totalorder %s1685_s6, %s1452_s30  ;;  %p1456_p10 = scmp.lt.u32.totalorder %s1452_s30, %s1685_s6 }
 0x6be   :  { %p1458_p11 = pnand %p1456_p10, %p1453_p9 }
 0x6c0   :  { %1461 = shalt.err (!%p1458_p11)
}
 0x6c1   :  { %1121 = dma.vmem_to_hbm [thread:$0]  %s1116_s28, 256, %s1685_s6, [#allocation4], %s1472_s9, %s1472_s9, %s1473_s10  }
 0x6c2   :  { %1468 = dma.done.wait [#allocation4], 256  }
 0x6c3   :  { %1469 = vsyncadd [#allocation4], 4294967040 }
 0x6c4   :  { %1125 = vsyncpa [#allocation3], 1 }
 0x6c5   :  { %1126 = vsyncpa [#allocation6], 1 }
 0x6c6   :  { %1127 = vsyncpa [#allocation9], 1 }
 0x6c7   :  { %1128 = vsyncpa [#allocation4], 1 }

</bundles_post_ra>
